<compile_context>
chip_gen: v5e
topology: v5e:2x2
jax: 0.10.0
libtpu: 0.0.40
codegen_flags: <defaults>
</compile_context>

<pallas_src>
import jax
import jax.numpy as jnp
from jax.experimental import pallas as pl
from jax.experimental.pallas import tpu as pltpu

# ---- model configuration (small, consistent with the module's __init__) ----
N_PHASES = 4                  # embedding channels
N_JOINTS = 4                  # -> input_channels = n_joints * 3 = 12
LENGTH   = 9                  # sequence length == Conv1d kernel size (odd => 'same')
BATCH    = 2
EPS      = 1e-5               # BatchNorm eps

INPUT_CH = N_JOINTS * 3       # 12
INTER_CH = INPUT_CH // 3      # 4
FLAT_F   = INPUT_CH * LENGTH  # 108 = flattened (channel, time) feature dim
HOMOG    = FLAT_F             # lane carrying the constant 1.0 (bias trick)

PAD_F = 128                   # lane-dense padded feature dim (>= FLAT_F + 1)
PAD_B = 8                     # sublane-dense padded batch dim (f32 sublane tile)

HIGHEST = jax.lax.Precision.HIGHEST


# ----------------------------- Pallas kernel --------------------------------
def pae_forward_kernel(x_ref, w_ref, out_ref):
    """x_ref: (PAD_B, PAD_F); w_ref: (PAD_F, PAD_F); out_ref: (PAD_B, PAD_F).

    Conv band matrices, eval-BN affines and all biases are pre-folded into a
    single weight matrix (bias rides on the homogeneous lane of x), so the
    whole forward pass is one MXU matmul."""
    out_ref[...] = jnp.dot(x_ref[...], w_ref[...],
                           preferred_element_type=jnp.float32,
                           precision=HIGHEST)


# --------------------------- parameter setup (glue) -------------------------
def init_conv_params(key, c_out, c_in, k):
    """Deterministic Conv1d init (uniform, PyTorch-style bound 1/sqrt(fan_in))."""
    bound = 1.0 / jnp.sqrt(float(c_in * k))
    kw, kb = jax.random.split(key)
    w = jax.random.uniform(kw, (c_out, c_in, k), jnp.float32, -bound, bound)
    b = jax.random.uniform(kb, (c_out,), jnp.float32, -bound, bound)
    return w, b


def conv_band_matrix(w, T):
    """Turn a 'same'-padded Conv1d weight (C_out, C_in, K) into a dense
    (C_in*T, C_out*T) matmul weight:
      y[b, o*T + t] = sum_{c,s} x[b, c*T + s] * W[c*T + s, o*T + t]."""
    C_out, C_in, K = w.shape
    pad = (K - 1) // 2
    s = jnp.arange(T)[:, None]          # source time index
    t = jnp.arange(T)[None, :]          # output time index
    k_idx = s - t + pad                 # (T, T) tap index
    valid = ((k_idx >= 0) & (k_idx < K)).astype(w.dtype)
    kc = jnp.clip(k_idx, 0, K - 1)
    Wm = w[:, :, kc] * valid[None, None, :, :]        # (C_out, C_in, T, T)
    Wm = jnp.transpose(Wm, (1, 2, 0, 3))              # (C_in, T_src, C_out, T_out)
    return Wm.reshape(C_in * T, C_out * T)


def per_channel_to_flat(vec, T):
    """(C,) per-channel vector -> (1, C*T) flat row matching the flat layout."""
    return jnp.repeat(vec, T)[None, :]


def bn_eval_affine(c, T):
    """Eval-mode BatchNorm1d with default init: gamma=1, beta=0, mean=0, var=1."""
    gamma = jnp.ones((c,), jnp.float32)
    beta = jnp.zeros((c,), jnp.float32)
    mean = jnp.zeros((c,), jnp.float32)
    var = jnp.ones((c,), jnp.float32)
    scale = gamma / jnp.sqrt(var + EPS)
    shift = beta - mean * scale
    return per_channel_to_flat(scale, T), per_channel_to_flat(shift, T)


def prepare_packed_params(params, T=LENGTH):
    """Fold the entire affine chain ONCE per parameter set.

    Returns a single (PAD_F, PAD_F) f32 weight:
      rows [0, FLAT_F)   : W_total = W1' @ W2' @ W3' @ W4'   (BN folded per layer)
      row  HOMOG (=108)  : b_total (all conv biases + BN shifts chained through)
      everything else    : zero, so padded lanes stay exactly zero.
    """
    (w1, b1), (w2, b2), (w3, b3), (w4, b4) = params

    layers = [
        (w1, b1, INTER_CH),   # conv1   + bn_conv1
        (w2, b2, N_PHASES),   # conv2   + bn_conv2
        (w3, b3, INTER_CH),   # deconv1 + bn_deconv1
        (w4, b4, None),       # deconv2 (no BN)
    ]

    W_total = None
    b_total = None
    for w, b, bn_ch in layers:
        Wm = conv_band_matrix(w, T)                  # (C_in*T, C_out*T)
        Bf = per_channel_to_flat(b, T)               # (1, C_out*T)
        if bn_ch is not None:
            scale, shift = bn_eval_affine(bn_ch, T)  # (1, C_out*T)
            Wm = Wm * scale                          # column-wise scale
            Bf = Bf * scale + shift
        if W_total is None:
            W_total, b_total = Wm, Bf
        else:
            W_total = jnp.dot(W_total, Wm, precision=HIGHEST)
            b_total = jnp.dot(b_total, Wm, precision=HIGHEST) + Bf

    w_pad = jnp.zeros((PAD_F, PAD_F), jnp.float32)
    w_pad = w_pad.at[:FLAT_F, :FLAT_F].set(W_total)
    w_pad = w_pad.at[HOMOG, :FLAT_F].set(b_total[0])   # bias on homogeneous lane
    return w_pad


# ------------------------------- wrapper -------------------------------------
def _run_kernel(x_flat_padded, w_pad):
    vmem = pl.BlockSpec(memory_space=pltpu.MemorySpace.VMEM)
    return pl.pallas_call(
        pae_forward_kernel,
        out_shape=jax.ShapeDtypeStruct((PAD_B, PAD_F), jnp.float32),
        in_specs=[vmem, vmem],
        out_specs=vmem,
    )(x_flat_padded, w_pad)


def deep_phase_net_forward(x, w_pad, noise_key):
    """x: (B, INPUT_CH, LENGTH) float32 in the PyTorch NCL layout.
    w_pad: output of prepare_packed_params (computed once, reused)."""
    B, C, T = x.shape

    # Pad batch to 8 sublanes / features to 128 lanes; lane 108 carries 1.0
    # so the folded bias is applied by the matmul itself.
    x_flat = jnp.zeros((PAD_B, PAD_F), jnp.float32)
    x_flat = x_flat.at[:B, :C * T].set(x.reshape(B, C * T))
    x_flat = x_flat.at[:B, HOMOG].set(1.0)

    y_flat = _run_kernel(x_flat, w_pad)
    y_reconstructed = y_flat[:B, :C * T].reshape(B, C, T)

    # p, f, a, b are pure noise in the reference module (torch.randn)
    kp, kf, ka, kb = jax.random.split(noise_key, 4)
    p = jax.random.normal(kp, (B, N_PHASES, 1), jnp.float32)
    f = jax.random.normal(kf, (B, N_PHASES, 1), jnp.float32)
    a = jax.random.normal(ka, (B, N_PHASES, 1), jnp.float32)
    b_ = jax.random.normal(kb, (B, N_PHASES, 1), jnp.float32)
    return (y_reconstructed, p, a, f, b_)


# --------------------------- pure-JAX reference -------------------------------
def _ref_conv1d(x, w, b):
    pad = (w.shape[-1] - 1) // 2
    y = jax.lax.conv_general_dilated(
        x, w, window_strides=(1,), padding=[(pad, pad)],
        dimension_numbers=("NCH", "OIH", "NCH"), precision=HIGHEST)
    return y + b[None, :, None]


def _ref_forward(x, params):
    (w1, b1), (w2, b2), (w3, b3), (w4, b4) = params
    bn = 1.0 / jnp.sqrt(1.0 + EPS)   # eval BN with default stats (mean=0, var=1)
    y = _ref_conv1d(x, w1, b1) * bn
    y = _ref_conv1d(y, w2, b2) * bn
    y = _ref_conv1d(y, w3, b3) * bn
    y = _ref_conv1d(y, w4, b4)
    return y


# --------------------------------- main ---------------------------------------
if __name__ == "__main__":
    root = jax.random.PRNGKey(0)
    k_x, k1, k2, k3, k4, k_noise = jax.random.split(root, 6)

    params = (
        init_conv_params(k1, INTER_CH, INPUT_CH, LENGTH),   # conv1
        init_conv_params(k2, N_PHASES, INTER_CH, LENGTH),   # conv2
        init_conv_params(k3, INTER_CH, N_PHASES, LENGTH),   # deconv1
        init_conv_params(k4, INPUT_CH, INTER_CH, LENGTH),   # deconv2
    )

    # Hoisted: band-matrix expansion + BN/bias fold + chain collapse + padding,
    # done once per parameter set.
    w_pad = prepare_packed_params(params)
    w_pad = jax.block_until_ready(w_pad)

    x = jax.random.normal(k_x, (BATCH, INPUT_CH, LENGTH), jnp.float32)

    y_rec, p, a, f, b = deep_phase_net_forward(x, w_pad, k_noise)
    jax.block_until_ready((y_rec, p, a, f, b))

    y_ref = _ref_forward(x, params)
    assert y_rec.shape == (BATCH, INPUT_CH, LENGTH)
    assert p.shape == (BATCH, N_PHASES, 1)
    assert f.shape == (BATCH, N_PHASES, 1)
    assert a.shape == (BATCH, N_PHASES, 1)
    assert b.shape == (BATCH, N_PHASES, 1)
    assert jnp.allclose(y_rec, y_ref, atol=1e-4, rtol=1e-4), "mismatch vs JAX reference"

    print("KERNEL_OK")
</pallas_src>

<mosaic_0001>
module attributes {stable_mosaic.version = 11 : i64} {
  func.func @pae_forward_kernel(%arg0: memref<8x128xf32, #tpu.memory_space<vmem>>, %arg1: memref<128x128xf32, #tpu.memory_space<vmem>>, %arg2: memref<8x128xf32, #tpu.memory_space<vmem>>) attributes {dimension_semantics = [], scalar_prefetch = 0 : i64, scratch_operands = 0 : i64, tpu.core_type = #tpu.core_type<tc>} {
    %c0 = arith.constant 0 : index
    %c0_0 = arith.constant 0 : index
    %0 = vector.load %arg0[%c0, %c0_0] : memref<8x128xf32, #tpu.memory_space<vmem>>, vector<8x128xf32>
    %c0_1 = arith.constant 0 : index
    %c0_2 = arith.constant 0 : index
    %1 = vector.load %arg1[%c0_1, %c0_2] : memref<128x128xf32, #tpu.memory_space<vmem>>, vector<128x128xf32>
    %cst = arith.constant dense<0.000000e+00> : vector<8x128xf32>
    %2 = tpu.matmul %0, %1, %cst {dimension_numbers = #tpu.dot_dimension_numbers<[1], [0], [0], [1], [0, 0, 1, 1], [], []>, precision = #tpu.contract_precision<fp32>} : vector<8x128xf32>, vector<128x128xf32>, vector<8x128xf32> -> vector<8x128xf32>
    %c0_3 = arith.constant 0 : index
    %c0_4 = arith.constant 0 : index
    %3 = vector.load %arg2[%c0_3, %c0_4] : memref<8x128xf32, #tpu.memory_space<vmem>>, vector<8x128xf32>
    tpu.vector_store %arg2[%c0_3, %c0_4], %2 {strides = array<i32>} : memref<8x128xf32, #tpu.memory_space<vmem>>, vector<8x128xf32>,
    return
  }
}

</mosaic_0001>

<bundles_post_ra>
// kernel: tpu_custom_call.1
= control target key start
LH: loop header
LB: loop body
LE: loop exit
PB: predicated region body
PF: predicated region fallthrough
CT: control target
= control target key end

     0   :  { %7 = vsyncpa [#allocation3], 0  ;;  %s769_s0 = inlined_call_operand.hbm [shape: f32[8,128], index: 0, kind: input, shape index: {}]   ;;  %s770_s1 = inlined_call_operand.hbm [shape: f32[128,128], index: 1, kind: input, shape index: {}]   ;;  %s771_s2 = inlined_call_operand.hbm [shape: f32[8,128], index: 2, kind: output, shape index: {}]  }
   0x1   :  { %8 = vsyncpa [#allocation6], 0 }
   0x2   :  { %9 = vsyncpa [#allocation4], 0  ;;  %s15_s11 = sshll.u32 %s769_s0, 4  ;;  %s502_s12 = smov [#allocation2]   ;;  %s16_s11 = int_to_ptr.hbm [resolvable:$true] %s15_s11 }
   0x3   :  { %s17_s13 = sshll.u32 %s502_s12, 4  ;;  %s25_s16 = sshll.u32 %s770_s1, 4  ;;  %s18_s13 = int_to_ptr.vmem [resolvable:$true] %s17_s13  ;;  %s26_s16 = int_to_ptr.hbm [resolvable:$true] %s25_s16 }
   0x4   :  { %20 = dma.hbm_to_vmem [thread:$0]  %s16_s11, 128, %s18_s13, [#allocation3]  }
   0x5   :  { %s503_s17 = smov [#allocation5]   ;;  %s504_s19 = smov 128  }
   0x6   :  { %s27_s18 = sshll.u32 %s503_s17, 4  ;;  %s505_s20 = smov 8   ;;  %s28_s18 = int_to_ptr.vmem [resolvable:$true] %s27_s18 }
   0x7   :  { %33 = dma.hbm_to_vmem [thread:$0]  %s26_s16, 2048, %s28_s18, [#allocation6], %s504_s19, %s504_s19, %s505_s20  }
   0x8   :  { %496 = dma.done.wait [#allocation3], 128  }
   0x9   :  { %497 = vsyncadd [#allocation3], 4294967168 }
   0xa   :  { %498 = dma.done.wait [#allocation6], 2048  }
   0xb   :  { %499 = vsyncadd [#allocation6], 4294965248  ;;  %v58_v0 = vld [vmem:[#allocation5 + $0x78] sm:$0xff]  ;;  %v57_v1 = vld [vmem:[#allocation5 + $0x70] sm:$0xff]  ;;  %s506_s0 = smov [#allocation7]   ;;  %s408_s23 = sshll.u32 %s771_s2, 4  ;;  %s409_s23 = int_to_ptr.hbm [resolvable:$true] %s408_s23 }
   0xc   :  { %v56_v2 = vld [vmem:[#allocation5 + $0x68] sm:$0xff]  ;;  %v528_v3 = vand.u32 4294901760, %v58_v0  ;;  %v530_v4 = vand.u32 4294901760, %v57_v1  ;;  %v55_v6 = vld [vmem:[#allocation5 + $0x60] sm:$0xff]  ;;  %v54_v7 = vld [vmem:[#allocation5 + $0x58] sm:$0xff]  ;;  %s406_s1 = sshll.u32 %s506_s0, 4  ;;  %s407_s1 = int_to_ptr.vmem [resolvable:$true] %s406_s1 }
   0xd   :  { %v532_v5 = vand.u32 4294901760, %v56_v2  ;;  %v53_v8 = vld [vmem:[#allocation5 + $0x50] sm:$0xff]  ;;  %v534_v9 = vand.u32 4294901760, %v55_v6  ;;  %v536_v10 = vand.u32 4294901760, %v54_v7  ;;  %v52_v12 = vld [vmem:[#allocation5 + $0x48] sm:$0xff]  ;;  %v51_v13 = vld [vmem:[#allocation5 + $0x40] sm:$0xff] }
   0xe   :  { %v538_v11 = vand.u32 4294901760, %v53_v8  ;;  %60 = vmatpush.msra.mxu0 %v528_v3  ;;  %v542_v14 = vsub.f32 %v58_v0, %v528_v3  ;;  %v545_v15 = vsub.f32 %v57_v1, %v530_v4  ;;  %v550_v17 = vand.u32 4294901760, %v52_v12  ;;  %v50_v18 = vld [vmem:[#allocation5 + $0x38] sm:$0xff]  ;;  %256 = vmatpush.msra.mxu3 %v528_v3  ;;  %v49_v26 = vld [vmem:[#allocation5 + $0x30] sm:$0xff]  ;;  %v48_v36 = vld [vmem:[#allocation5 + $0x28] sm:$0xff] }
   0xf   :  { %v548_v16 = vsub.f32 %v56_v2, %v532_v5  ;;  %v554_v19 = vsub.f32 %v55_v6, %v534_v9  ;;  %v557_v20 = vsub.f32 %v54_v7, %v536_v10  ;;  %v566_v25 = vand.u32 4294901760, %v51_v13  ;;  %v47_v42 = vld [vmem:[#allocation5 + $0x20] sm:$0xff]  ;;  %v46_v47 = vld [vmem:[#allocation5 + $0x18] sm:$0xff]  ;;  %v45_v55 = vld [vmem:[#allocation5 + $0x10] sm:$0xff] }
  0x10   :  { %v560_v21 = vsub.f32 %v53_v8, %v538_v11  ;;  %62 = vmatpush.msra.mxu0 %v530_v4  ;;  %v102_v22 = vand.u32 4294901760, %v542_v14  ;;  %v108_v23 = vand.u32 4294901760, %v545_v15  ;;  %203 = vmatpush.msra.mxu2 %v542_v14  ;;  %v570_v28 = vand.u32 4294901760, %v50_v18  ;;  %v44_v60 = vld [vmem:[#allocation5 + $0x8] sm:$0xff]  ;;  %v43_v1 = vld [vmem:[#allocation5] sm:$0xff]  ;;  %v42_v7 = vld [vmem:[#allocation2] sm:$0xff] }
  0x11   :  { %v114_v24 = vand.u32 4294901760, %v548_v16  ;;  %v120_v27 = vand.u32 4294901760, %v554_v19  ;;  %v573_v29 = vsub.f32 %v52_v12, %v550_v17  ;;  %258 = vmatpush.msra.mxu3 %v530_v4  ;;  %v126_v33 = vand.u32 4294901760, %v557_v20 }
  0x12   :  { %64 = vmatpush.msra.mxu0 %v532_v5  ;;  %v103_v30 = vsub.f32 %v542_v14, %v102_v22  ;;  %v109_v31 = vsub.f32 %v545_v15, %v108_v23  ;;  %206 = vmatpush.msra.mxu2 %v545_v15  ;;  %v132_v34 = vand.u32 4294901760, %v560_v21  ;;  %v589_v35 = vand.u32 4294901760, %v49_v26 }
  0x13   :  { %v115_v32 = vsub.f32 %v548_v16, %v114_v24  ;;  %260 = vmatpush.msra.mxu3 %v532_v5  ;;  %v121_v39 = vsub.f32 %v554_v19, %v120_v27  ;;  %v597_v40 = vsub.f32 %v51_v13, %v566_v25  ;;  %v138_v41 = vand.u32 4294901760, %v573_v29 }
  0x14   :  { %v104_v37 = vand.u32 4294901760, %v103_v30  ;;  %66 = vmatpush.msra.mxu0 %v534_v9  ;;  %v110_v38 = vand.u32 4294901760, %v109_v31  ;;  %209 = vmatpush.msra.mxu2 %v548_v16  ;;  %v127_v44 = vsub.f32 %v557_v20, %v126_v33  ;;  %v606_v45 = vand.u32 4294901760, %v48_v36 }
  0x15   :  { %262 = vmatpush.msra.mxu3 %v534_v9  ;;  %v116_v43 = vand.u32 4294901760, %v115_v32  ;;  %v609_v46 = vsub.f32 %v50_v18, %v570_v28  ;;  %v133_v48 = vsub.f32 %v560_v21, %v132_v34  ;;  %v122_v49 = vand.u32 4294901760, %v121_v39 }
  0x16   :  { %105 = vmatpush.msra.mxu1 %v104_v37  ;;  %68 = vmatpush.msra.mxu0 %v536_v10  ;;  %v144_v50 = vand.u32 4294901760, %v597_v40  ;;  %v618_v51 = vand.u32 4294901760, %v47_v42  ;;  %v621_v52 = vsub.f32 %v49_v26, %v589_v35  ;;  %v139_v53 = vsub.f32 %v573_v29, %v138_v41 }
  0x17   :  { %212 = vmatpush.msra.mxu2 %v554_v19  ;;  %264 = vmatpush.msra.mxu3 %v536_v10  ;;  %v626_v54 = vand.u32 4294901760, %v46_v47  ;;  %v128_v56 = vand.u32 4294901760, %v127_v44  ;;  %v150_v57 = vand.u32 4294901760, %v609_v46  ;;  %v633_v58 = vsub.f32 %v48_v36, %v606_v45 }
  0x18   :  { %111 = vmatpush.msra.mxu1 %v110_v38  ;;  %70 = vmatpush.msra.mxu0 %v538_v11  ;;  %v134_v59 = vand.u32 4294901760, %v133_v48  ;;  %v145_v61 = vsub.f32 %v597_v40, %v144_v50  ;;  %v156_v62 = vand.u32 4294901760, %v621_v52  ;;  %v642_v63 = vand.u32 4294901760, %v45_v55 }
  0x19   :  { %215 = vmatpush.msra.mxu2 %v557_v20  ;;  %266 = vmatpush.msra.mxu3 %v538_v11  ;;  %v645_v0 = vsub.f32 %v47_v42, %v618_v51  ;;  %v140_v2 = vand.u32 4294901760, %v139_v53  ;;  %v648_v6 = vsub.f32 %v46_v47, %v626_v54  ;;  %v151_v8 = vsub.f32 %v609_v46, %v150_v57 }
  0x1a   :  { %117 = vmatpush.msra.mxu1 %v116_v43  ;;  %72 = vmatpush.msra.mxu0 %v550_v17  ;;  %v162_v12 = vand.u32 4294901760, %v633_v58  ;;  %v657_v13 = vand.u32 4294901760, %v44_v60  ;;  %v659_v18 = vand.u32 4294901760, %v42_v7  ;;  %v661_v26 = vand.u32 4294901760, %v43_v1 }
  0x1b   :  { %218 = vmatpush.msra.mxu2 %v560_v21  ;;  %268 = vmatpush.msra.mxu3 %v550_v17  ;;  %v146_v30 = vand.u32 4294901760, %v145_v61  ;;  %v157_v31 = vsub.f32 %v621_v52, %v156_v62  ;;  %v168_v32 = vand.u32 4294901760, %v645_v0  ;;  %v671_v36 = vsub.f32 %v45_v55, %v642_v63 }
  0x1c   :  { %123 = vmatpush.msra.mxu1 %v122_v49  ;;  %74 = vmatpush.msra.mxu0 %v566_v25  ;;  %v174_v37 = vand.u32 4294901760, %v648_v6  ;;  %v152_v38 = vand.u32 4294901760, %v151_v8  ;;  %v163_v39 = vsub.f32 %v633_v58, %v162_v12  ;;  %v681_v42 = vsub.f32 %v44_v60, %v657_v13 }
  0x1d   :  { %221 = vmatpush.msra.mxu2 %v573_v29  ;;  %270 = vmatpush.msra.mxu3 %v566_v25  ;;  %v92_v43 = vsub.f32 %v42_v7, %v659_v18  ;;  %v158_v44 = vand.u32 4294901760, %v157_v31  ;;  %v169_v47 = vsub.f32 %v645_v0, %v168_v32  ;;  %v180_v48 = vand.u32 4294901760, %v671_v36 }
  0x1e   :  { %129 = vmatpush.msra.mxu1 %v128_v56  ;;  %76 = vmatpush.msra.mxu0 %v570_v28  ;;  %v692_v49 = vsub.f32 %v43_v1, %v661_v26  ;;  %v164_v53 = vand.u32 4294901760, %v163_v39  ;;  %v175_v55 = vsub.f32 %v648_v6, %v174_v37  ;;  %v186_v56 = vand.u32 4294901760, %v681_v42 }
  0x1f   :  { %224 = vmatpush.msra.mxu2 %v597_v40  ;;  %272 = vmatpush.msra.mxu3 %v570_v28  ;;  %v170_v60 = vand.u32 4294901760, %v169_v47  ;;  %v181_v61 = vsub.f32 %v671_v36, %v180_v48 }
  0x20   :  { %135 = vmatpush.msra.mxu1 %v134_v59  ;;  %78 = vmatpush.msra.mxu0 %v589_v35  ;;  %v93_v59 = vand.u32 4294901760, %v92_v43  ;;  %v192_v1 = vand.u32 4294901760, %v692_v49  ;;  %v187_v7 = vsub.f32 %v681_v42, %v186_v56 }
  0x21   :  { %227 = vmatpush.msra.mxu2 %v609_v46  ;;  %274 = vmatpush.msra.mxu3 %v589_v35 }
  0x22   :  { %141 = vmatpush.msra.mxu1 %v140_v2  ;;  %80 = vmatpush.msra.mxu0 %v606_v45  ;;  %v176_v2 = vand.u32 4294901760, %v175_v55  ;;  %v94_v8 = vsub.f32 %v92_v43, %v93_v59  ;;  %v193_v31 = vsub.f32 %v692_v49, %v192_v1 }
  0x23   :  { %230 = vmatpush.msra.mxu2 %v621_v52  ;;  %276 = vmatpush.msra.mxu3 %v606_v45 }
  0x24   :  { %147 = vmatpush.msra.mxu1 %v146_v30  ;;  %82 = vmatpush.msra.mxu0 %v618_v51  ;;  %v182_v30 = vand.u32 4294901760, %v181_v61  ;;  %v95_v39 = vand.u32 4294901760, %v94_v8 }
  0x25   :  { %233 = vmatpush.msra.mxu2 %v633_v58  ;;  %278 = vmatpush.msra.mxu3 %v618_v51 }
  0x26   :  { %153 = vmatpush.msra.mxu1 %v152_v38  ;;  %84 = vmatpush.msra.mxu0 %v626_v54  ;;  %v188_v38 = vand.u32 4294901760, %v187_v7 }
  0x27   :  { %236 = vmatpush.msra.mxu2 %v645_v0  ;;  %280 = vmatpush.msra.mxu3 %v626_v54 }
  0x28   :  { %159 = vmatpush.msra.mxu1 %v158_v44  ;;  %86 = vmatpush.msra.mxu0 %v642_v63  ;;  %v194_v44 = vand.u32 4294901760, %v193_v31 }
  0x29   :  { %239 = vmatpush.msra.mxu2 %v648_v6  ;;  %282 = vmatpush.msra.mxu3 %v642_v63 }
  0x2a   :  { %165 = vmatpush.msra.mxu1 %v164_v53  ;;  %88 = vmatpush.msra.mxu0 %v657_v13 }
  0x2b   :  { %242 = vmatpush.msra.mxu2 %v671_v36  ;;  %284 = vmatpush.msra.mxu3 %v657_v13 }
  0x2c   :  { %171 = vmatpush.msra.mxu1 %v170_v60  ;;  %90 = vmatpush.msra.mxu0 %v661_v26 }
  0x2d   :  { %245 = vmatpush.msra.mxu2 %v681_v42  ;;  %286 = vmatpush.msra.mxu3 %v661_v26 }
  0x2e   :  { %297 = vmatpush.msrb.mxu0 %v102_v22  ;;  %177 = vmatpush.msra.mxu1 %v176_v2 }
  0x2f   :  { %248 = vmatpush.msra.mxu2 %v692_v49  ;;  %290 = vmatmul.f32.vlgmr.msra.gmra.mxu3 %v93_v59 }
  0x30   :  { %301 = vmatpush.msrb.mxu0 %v108_v23  ;;  %183 = vmatpush.msra.mxu1 %v182_v30 }
  0x31   :  { %251 = vmatmul.f32.vlgmr.msra.gmra.mxu2 %v92_v43  ;;  %96 = vmatmul.f32.vlgmr.msra.gmra.mxu0 %v95_v39 }
  0x32   :  { %305 = vmatpush.msrb.mxu0 %v114_v24  ;;  %189 = vmatpush.msra.mxu1 %v188_v38 }
  0x34   :  { %309 = vmatpush.msrb.mxu0 %v120_v27  ;;  %195 = vmatpush.msra.mxu1 %v194_v44 }
  0x35   :  { %197 = vmatmul.f32.vlgmr.msra.gmra.mxu1 %v659_v18 }
  0x36   :  { %364 = vmatpush.msrb.mxu1 %v528_v3  ;;  %313 = vmatpush.msrb.mxu0 %v126_v33 }
  0x38   :  { %366 = vmatpush.msrb.mxu1 %v530_v4  ;;  %317 = vmatpush.msrb.mxu0 %v132_v34 }
  0x3a   :  { %368 = vmatpush.msrb.mxu1 %v532_v5  ;;  %321 = vmatpush.msrb.mxu0 %v138_v41 }
  0x3c   :  { %370 = vmatpush.msrb.mxu1 %v534_v9  ;;  %325 = vmatpush.msrb.mxu0 %v144_v50 }
  0x3e   :  { %372 = vmatpush.msrb.mxu1 %v536_v10  ;;  %329 = vmatpush.msrb.mxu0 %v150_v57 }
  0x40   :  { %374 = vmatpush.msrb.mxu1 %v538_v11  ;;  %333 = vmatpush.msrb.mxu0 %v156_v62 }
  0x42   :  { %376 = vmatpush.msrb.mxu1 %v550_v17  ;;  %337 = vmatpush.msrb.mxu0 %v162_v12 }
  0x44   :  { %378 = vmatpush.msrb.mxu1 %v566_v25  ;;  %341 = vmatpush.msrb.mxu0 %v168_v32 }
  0x46   :  { %380 = vmatpush.msrb.mxu1 %v570_v28  ;;  %345 = vmatpush.msrb.mxu0 %v174_v37 }
  0x48   :  { %382 = vmatpush.msrb.mxu1 %v589_v35  ;;  %349 = vmatpush.msrb.mxu0 %v180_v48 }
  0x4a   :  { %384 = vmatpush.msrb.mxu1 %v606_v45  ;;  %353 = vmatpush.msrb.mxu0 %v186_v56 }
  0x4c   :  { %386 = vmatpush.msrb.mxu1 %v618_v51  ;;  %357 = vmatpush.msrb.mxu0 %v192_v1 }
  0x4d   :  { %359 = vmatmul.f32.vlgmr.msrb.gmra.mxu0 %v659_v18 }
  0x4e   :  { %388 = vmatpush.msrb.mxu1 %v626_v54 }
  0x50   :  { %390 = vmatpush.msrb.mxu1 %v642_v63 }
  0x52   :  { %392 = vmatpush.msrb.mxu1 %v657_v13 }
  0x54   :  { %394 = vmatpush.msrb.mxu1 %v661_v26 }
  0x55   :  { %396 = vmatmul.f32.vlgmr.msrb.gmra.mxu1 %v659_v18 }
  0xae   :  { %v97_v4 = vpop.f32.mrf.mxu0 }
  0xb2   :  { %v198_v3 = vpop.f32.mrf.mxu1  ;;  %v291_v11 = vpop.f32.mrf.mxu3 }
  0xb3   :  { %v199_v5 = vadd.f32 %v198_v3, %v97_v4 }
  0xb4   :  { %v252_v9 = vpop.f32.mrf.mxu2 }
  0xb5   :  { %v253_v10 = vadd.f32 %v252_v9, %v199_v5 }
  0xb7   :  { %v292_v14 = vadd.f32 %v291_v11, %v253_v10 }
  0xca   :  { %v360_v15 = vpop.f32.mrf.mxu0 }
  0xcb   :  { %v361_v16 = vadd.f32 %v360_v15, %v292_v14 }
  0xd2   :  { %v397_v17 = vpop.f32.mrf.mxu1 }
  0xd3   :  { %v398_v19 = vadd.f32 %v397_v17, %v361_v16 }
  0xd5   :  { %400 = vst [vmem:[#allocation7] sm:$0xff] %v398_v19 }
  0xd6   :  { %411 = dma.vmem_to_hbm [thread:$0]  %s407_s1, 128, %s409_s23, [#allocation4]  }
  0xd7   :  { %500 = dma.done.wait [#allocation4], 128  }
  0xd8   :  { %501 = vsyncadd [#allocation4], 4294967168 }
  0xd9   :  { %416 = vsyncpa [#allocation3], 1 }
  0xda   :  { %417 = vsyncpa [#allocation6], 1 }
  0xdb   :  { %418 = vsyncpa [#allocation4], 1 }

</bundles_post_ra>
